<compile_context>
chip_gen: v6e
topology: v6e:2x2x1
jax: 0.10.0
libtpu: 0.0.40
codegen_flags: <defaults>
</compile_context>

<pallas_src>
import jax
import jax.numpy as jnp
from jax.experimental import pallas as pl
from jax.experimental.pallas import tpu as pltpu


def _film_kernel(scale_ref, shift_ref, x_ref, o_ref):
    # scale_ref, shift_ref: (C, 1)        modulation for this batch element
    # x_ref, o_ref:         (C, tile_t)   feature-map tile (C sublanes, T lanes)
    x = x_ref[...]
    o_ref[...] = (x * scale_ref[...] + shift_ref[...]).astype(o_ref.dtype)


def _pick_tile_t(T, C, itemsize, max_tile_t=2048, vmem_budget_bytes=16 << 20):
    """Largest lane-dense T tile keeping double-buffered in+out under budget."""
    # 4 buffers of (C, tile_t): double-buffered input + double-buffered output.
    by_vmem = vmem_budget_bytes // max(1, 4 * C * itemsize)
    by_vmem = max(128, (by_vmem // 128) * 128)
    if T <= by_vmem and T <= max_tile_t:
        return int(T)                          # full extent: always a legal block shape
    return int(min(by_vmem, max_tile_t))       # multiple of 128; last block may be OOB-padded


def film_pallas(x, cond, weight, bias):
    """FiLM forward.

    x:      (B, C, T)
    cond:   (B, cond_dim)
    weight: (2C, cond_dim)   (PyTorch nn.Linear layout)
    bias:   (2C,)
    """
    B, C, T = x.shape
    cond_dim = cond.shape[1]
    assert weight.shape == (2 * C, cond_dim)
    assert bias.shape == (2 * C,)

    # --- FiLM linear, hoisted out of the grid loop: one batched MXU matmul ---
    mod = (jnp.dot(cond, weight.T, preferred_element_type=jnp.float32)
           + bias.astype(jnp.float32))                       # (B, 2C)
    scale = mod[:, :C].reshape(B, C, 1)                      # (B, C, 1)
    shift = mod[:, C:].reshape(B, C, 1)                      # (B, C, 1)

    itemsize = jnp.dtype(x.dtype).itemsize
    tile_t = _pick_tile_t(T, C, itemsize)
    n_t = pl.cdiv(T, tile_t)

    cost = pl.CostEstimate(
        flops=2 * B * C * T,                                  # one fma per element
        transcendentals=0,
        bytes_accessed=2 * B * C * T * itemsize + 2 * B * C * 4,
    )

    return pl.pallas_call(
        _film_kernel,
        out_shape=jax.ShapeDtypeStruct((B, C, T), x.dtype),
        grid_spec=pltpu.PrefetchScalarGridSpec(
            num_scalar_prefetch=0,
            grid=(B, n_t),
            in_specs=[
                # (C, 1) modulation columns: last block dim == full array dim.
                pl.BlockSpec((pl.Squeezed(), C, 1), lambda b, t: (b, 0, 0)),
                pl.BlockSpec((pl.Squeezed(), C, 1), lambda b, t: (b, 0, 0)),
                # lane-dense feature-map tile
                pl.BlockSpec((pl.Squeezed(), C, tile_t), lambda b, t: (b, 0, t)),
            ],
            out_specs=pl.BlockSpec((pl.Squeezed(), C, tile_t),
                                   lambda b, t: (b, 0, t)),
        ),
        compiler_params=pltpu.CompilerParams(
            dimension_semantics=("parallel", "parallel"),
            vmem_limit_bytes=32 * 1024 * 1024,
        ),
        cost_estimate=cost,
    )(scale, shift, x)


def film_reference(x, cond, weight, bias):
    mod = cond @ weight.T + bias         # (B, 2C)
    C = x.shape[1]
    return x * mod[:, :C][..., None] + mod[:, C:][..., None]


if __name__ == "__main__":
    B, C, T, COND_DIM = 2, 4, 16, 8

    key = jax.random.PRNGKey(0)
    kx, kc, kw, kb = jax.random.split(key, 4)

    x = jax.random.normal(kx, (B, C, T), dtype=jnp.float32)
    cond = jax.random.normal(kc, (B, COND_DIM), dtype=jnp.float32)

    # Deterministic "Linear(cond_dim, 2*channels)" parameters
    # (PyTorch-style uniform(-1/sqrt(cond_dim), 1/sqrt(cond_dim))).
    bound = 1.0 / (COND_DIM ** 0.5)
    weight = jax.random.uniform(kw, (2 * C, COND_DIM),
                                minval=-bound, maxval=bound, dtype=jnp.float32)
    bias = jax.random.uniform(kb, (2 * C,),
                              minval=-bound, maxval=bound, dtype=jnp.float32)

    out = film_pallas(x, cond, weight, bias)
    out = jax.block_until_ready(out)

    ref = film_reference(x, cond, weight, bias)
    assert out.shape == (B, C, T)
    assert jnp.allclose(out, ref, atol=1e-5, rtol=1e-5), "mismatch vs reference"

    print("KERNEL_OK")
</pallas_src>

<mosaic_0001>
module attributes {stable_mosaic.version = 11 : i64} {
  func.func @_film_kernel(%arg0: i32, %arg1: i32, %arg2: memref<1x4x1xf32, #tpu.memory_space<vmem>>, %arg3: memref<1x4x1xf32, #tpu.memory_space<vmem>>, %arg4: memref<1x4x16xf32, #tpu.memory_space<vmem>>, %arg5: memref<1x4x16xf32, #tpu.memory_space<vmem>>) attributes {dimension_semantics = [#tpu.dimension_semantics<parallel>, #tpu.dimension_semantics<parallel>], iteration_bounds = array<i64: 2, 1>, scalar_prefetch = 0 : i64, scratch_operands = 0 : i64, tpu.core_type = #tpu.core_type<tc>, window_params = [{transform_indices = @transform_0, window_bounds = array<i64: 1, 4, 1>}, {transform_indices = @transform_1, window_bounds = array<i64: 1, 4, 1>}, {transform_indices = @transform_2, window_bounds = array<i64: 1, 4, 16>}, {transform_indices = @transform_3, window_bounds = array<i64: 1, 4, 16>}]} {
    %c0 = arith.constant 0 : index
    %c0_0 = arith.constant 0 : index
    %c0_1 = arith.constant 0 : index
    %0 = vector.load %arg4[%c0, %c0_0, %c0_1] : memref<1x4x16xf32, #tpu.memory_space<vmem>>, vector<1x4x16xf32>
    %1 = vector.shape_cast %0 : vector<1x4x16xf32> to vector<4x16xf32>
    %c0_2 = arith.constant 0 : index
    %c0_3 = arith.constant 0 : index
    %c0_4 = arith.constant 0 : index
    %2 = vector.load %arg2[%c0_2, %c0_3, %c0_4] : memref<1x4x1xf32, #tpu.memory_space<vmem>>, vector<1x4x1xf32>
    %3 = vector.shape_cast %2 : vector<1x4x1xf32> to vector<4x1xf32>
    %4 = vector.broadcast %3 : vector<4x1xf32> to vector<4x16xf32>
    %5 = arith.mulf %1, %4 : vector<4x16xf32>
    %c0_5 = arith.constant 0 : index
    %c0_6 = arith.constant 0 : index
    %c0_7 = arith.constant 0 : index
    %6 = vector.load %arg3[%c0_5, %c0_6, %c0_7] : memref<1x4x1xf32, #tpu.memory_space<vmem>>, vector<1x4x1xf32>
    %7 = vector.shape_cast %6 : vector<1x4x1xf32> to vector<4x1xf32>
    %8 = vector.broadcast %7 : vector<4x1xf32> to vector<4x16xf32>
    %9 = arith.addf %5, %8 : vector<4x16xf32>
    %c0_8 = arith.constant 0 : index
    %c0_9 = arith.constant 0 : index
    %c0_10 = arith.constant 0 : index
    %10 = vector.load %arg5[%c0_8, %c0_9, %c0_10] : memref<1x4x16xf32, #tpu.memory_space<vmem>>, vector<1x4x16xf32>
    %11 = vector.shape_cast %10 : vector<1x4x16xf32> to vector<4x16xf32>
    %12 = vector.shape_cast %9 : vector<4x16xf32> to vector<1x4x16xf32>
    tpu.vector_store %arg5[%c0_8, %c0_9, %c0_10], %12 {strides = array<i32>} : memref<1x4x16xf32, #tpu.memory_space<vmem>>, vector<1x4x16xf32>,
    return
  }
  func.func @transform_0(%arg0: i32, %arg1: i32) -> (i32, i32, i32) {
    %c0_i32 = arith.constant 0 : i32
    %c0_i32_0 = arith.constant 0 : i32
    %c0_i32_1 = arith.constant 0 : i32
    return %arg0, %c0_i32, %c0_i32_0 : i32, i32, i32
  }
  func.func @transform_1(%arg0: i32, %arg1: i32) -> (i32, i32, i32) {
    %c0_i32 = arith.constant 0 : i32
    %c0_i32_0 = arith.constant 0 : i32
    %c0_i32_1 = arith.constant 0 : i32
    return %arg0, %c0_i32, %c0_i32_0 : i32, i32, i32
  }
  func.func @transform_2(%arg0: i32, %arg1: i32) -> (i32, i32, i32) {
    %c0_i32 = arith.constant 0 : i32
    %c0_i32_0 = arith.constant 0 : i32
    return %arg0, %c0_i32, %arg1 : i32, i32, i32
  }
  func.func @transform_3(%arg0: i32, %arg1: i32) -> (i32, i32, i32) {
    %c0_i32 = arith.constant 0 : i32
    %c0_i32_0 = arith.constant 0 : i32
    return %arg0, %c0_i32, %arg1 : i32, i32, i32
  }
}

</mosaic_0001>

<bundles_post_ra>
// kernel: tpu_custom_call.1
= control target key start
LH: loop header
LB: loop body
LE: loop exit
PB: predicated region body
PF: predicated region fallthrough
CT: control target
= control target key end

     0   :  { %8 = vsyncpa [#allocation3], 0  ;;  %s627_s0 = inlined_call_operand.vmem [shape: f32[2,4,1], index: 0, kind: input, shape index: {}]   ;;  %s628_s1 = inlined_call_operand.vmem [shape: f32[2,4,1], index: 1, kind: input, shape index: {}]   ;;  %s629_s2 = inlined_call_operand.vmem [shape: f32[2,4,16], index: 2, kind: input, shape index: {}]   ;;  %s630_s3 = inlined_call_operand.hbm [shape: f32[2,4,16], index: 3, kind: output, shape index: {}]  }
   0x1   :  { %10 = vsyncpa [#allocation3 + $0x1], 0  ;;  %s522_s12 = smov 0   ;;  %s524_s13 = smov 0  }
   0x2   :  { %s526_s14 = smov 0   ;;  %s528_s15 = smov 0  }
   0x3   :  { %s530_s16 = smov 0   ;;  %s532_s17 = smov 0  }
   0x4 LB: > { %s352_s18 = sadd.s32 4294967295, %s498_s17   ;;  %s353_s19 = sadd.s32 4294967294, %s498_s17   ;;  %s498_s17 = sphi %s532_s17, %s16_s17   ;;  %s494_s16 = sphi %s530_s16, %s637_s16   ;;  %s490_s15 = sphi %s528_s15, %s636_s15   ;;  %s486_s14 = sphi %s526_s14, %s635_s14   ;;  %s482_s13 = sphi %s524_s13, %s634_s13   ;;  %s478_s12 = sphi %s522_s12, %s633_s12  }
   0x5   : > { %s28_s20 = sadd.s32 1, %s494_s16  ;;  %s117_s21 = sadd.s32 1, %s486_s14 }
   0x6   : > { %p30_p0 = scmp.ge.s32.totalorder %s28_s20, 2  ;;  %p127_p1 = scmp.ne.s32.totalorder %s486_s14, %s482_s13 }
   0x7   : > { %p128_p2 = scmp.eq.s32.totalorder %s352_s18, 1  ;;  %p133_p3 = scmp.ne.s32.totalorder %s482_s13, %s478_s12 }
   0x8   : > { %s639_s20 = smov (%p30_p0, %s28_s20), 0  ;;  %p134_p5 = scmp.eq.s32.totalorder %s353_s19, 1 }
   0x9   : > { %p562_p4 = por %p128_p2, %p127_p1  ;;  %s112_s23 = ssub.s32 %s494_s16, %s639_s20 }
   0xa   : > { %p356_p6 = scmp.ge.s32.totalorder %s498_s17, 1  ;;  %p115_p7 = scmp.eq.s32.totalorder %s112_s23, 0 }
   0xb   : > { %p569_p8 = por %p134_p5, %p133_p3  ;;  %p176_p9 = scmp.lt.s32.totalorder %s498_s17, 3 }
   0xc   : > { %s575_s25 = scalar_select %p115_p7, %s486_s14, %s117_s21  }
   0xd   : > { %p177_p10 = pnand %p356_p6, %p176_p9 }
   0xe   : > { %p210_p11 = scmp.lt.s32.totalorder (!%p177_p10), %s490_s15, 1  ;;  %s207_s7 = sand.u32 (!%p177_p10), 1, %s482_s13  }
   0xf   : > { %180 = sbr.rel (%p177_p10) target bundleno = 168 (0xa8), region = 32  ;;  %s357_s8 = sshll.u32 (!%p177_p10), %s207_s7, 2 }
  0x10   : > { %s362_s18 = sshll.u32 (!%p177_p10), %s490_s15, 6  ;;  %s209_s19 = scalar_lea.vmem (!%p177_p10), [#allocation2], %s357_s8 }
  0x11   : > { %s257_s21 = sshll.u32 (!%p177_p10), %s209_s19, 4  ;;  %s255_s28 = scalar_lea.hbm (!%p177_p10), %s630_s3, %s362_s18  ;;  %s258_s21 = int_to_ptr.vmem [resolvable:$true] %s257_s21 }
  0x12   : > { %s243_s29 = scalar_lea.sflag (!%p177_p10), [#allocation3], %s207_s7 }
  0x14   : > { %v500_v0 = vmov 0   ;;  %s211_s26 = scalar_select %p210_p11, %s490_s15, 1  ;;  %vm240_vm0 = vcmask 125952  }
  0x15   : > { %421 = vset.pattern.permute.xlu0 %v500_v0 }
  0x16   : > { %s358_s27 = sshll.u32 %s211_s26, 2 }
  0x17   : > { %s213_s30 = scalar_lea.vmem %s627_s0, %s358_s27  ;;  %s217_s6 = scalar_lea.vmem %s628_s1, %s358_s27 }
  0x18   : > { %v226_v1 = vld [vmem:[%s213_s30] sm:$0xf]  ;;  %s224_s11 = scalar_lea.vmem %s629_s2, %s358_s27  ;;  %s422_s30 = scalar_lea.vmem %s258_s21, 64 }
  0x19   : > { %229 = vperm.xlu0 %421, %v226_v1   ;;  %v233_v2 = vld [vmem:[%s217_s6] sm:$0xf]  ;;  %p423_p12 = scmp.ne.s32.totalorder %s258_s21, %s422_s30  ;;  %s501_s27 = smov [#allocation2]  }
  0x1a   : > { %v225_v3 = vld [vmem:[%s224_s11] sm:$0xf]  ;;  %s426_s15 = sshll.u32 %s501_s27, 4  ;;  %s427_s15 = int_to_ptr.vmem [resolvable:$false] %s426_s15 }
  0x1b   : > { %p424_p13 = pnand %p423_p12, %p562_p4  ;;  %s428_s4 = scalar_lea.vmem %s427_s15, 128 }
  0x1c   : > { %p429_p1 = scmp.lt.s32.totalorder %s258_s21, %s427_s15  ;;  %p430_p2 = scmp.lt.s32.totalorder %s428_s4, %s422_s30 }
  0x1d   : > { %236 = vperm.xlu0 %421, %v233_v2   ;;  %p425_p0 = pneg %p424_p13 }
  0x1e   : > { %p431_p3 = por %p430_p2, %p429_p1 }
  0x20   : > { %p432_p5 = pnand %p431_p3, %p425_p0 }
  0x94   : > { %v230_v4 = vpop.permute.xlu0 %229 }
  0x95   : > { %v232_v5 = vmul.f32 %v230_v4, %v225_v3 }
  0x98   : > { %v237_v6 = vpop.permute.xlu0 %236 }
  0x99   : > { %v239_v7 = vadd.f32 %v237_v6, %v232_v5 }
  0x9b   : > { %241 = vst.msk [vmem:[%s209_s19] sm:$0xf] %vm240_vm0, %v239_v7 }
  0x9c   : > { %435 = shalt.err (!%p432_p5)
}
  0x9d   : > { %s436_s5 = scalar_lea.hbm %s255_s28, 64  ;;  %s440_s8 = scalar_lea.hbm %s630_s3, 128 }
  0x9e   : > { %p437_p6 = scmp.ne.s32.totalorder %s255_s28, %s436_s5  ;;  %p441_p10 = scmp.lt.s32.totalorder %s255_s28, %s630_s3 }
  0x9f   : > { %p442_p11 = scmp.lt.s32.totalorder %s440_s8, %s436_s5 }
  0xa0   : > { %p438_p7 = pnand %p437_p6, %p562_p4 }
  0xa1   : > { %p443_p12 = por %p442_p11, %p441_p10 }
  0xa2   : > { %p439_p9 = pneg %p438_p7 }
  0xa4   : > { %p444_p13 = pnand %p443_p12, %p439_p9 }
  0xa6   : > { %447 = shalt.err (!%p444_p13)
}
  0xa7   : > { %365 = dma.vmem_to_hbm [thread:$0]  (%p562_p4), %s258_s21, 64, %s255_s28, %s243_s29  }
  0xa8 PF: > { %p371_p0 = scmp.ge.s32.totalorder %s498_s17, 2  ;;  %s269_s11 = sand.u32 1, %s478_s12  }
  0xa9   : > { %s270_s18 = scalar_lea.sflag [#allocation3], %s269_s11 }
  0xaa   : > { %p368_p1 = pnand %p371_p0, %p569_p8 }
  0xac   : > { %p369_p2 = pneg %p368_p1 }
  0xae   : > { %473 = dma.done.wait (%p369_p2), %s270_s18, 64  }
  0xaf   : > { %475 = vsyncadd (%p369_p2), %s270_s18, 4294967232  ;;  %s16_s17 = sadd.s32 1, %s498_s17   ;;  %s633_s12 = smov %s482_s13 }
  0xb0   : > { %p13_p3 = scmp.ge.s32.totalorder %s16_s17, 4   ;;  %s634_s13 = smov %s486_s14 }
  0xb1   : > { %s635_s14 = smov %s575_s25  ;;  %s636_s15 = smov %s494_s16 }
  0xb2   : > { %s637_s16 = smov %s639_s20  ;;  %15 = sbr.rel (!%p13_p3) target bundleno = 4 (0x4), region = 73 }
  0xb7   :  { %275 = vsyncpa [#allocation3], 1 }
  0xb8   :  { %277 = vsyncpa [#allocation3 + $0x1], 1 }

</bundles_post_ra>
